<compile_context>
chip_gen: v5e
topology: v5e:2x2
jax: 0.10.0
libtpu: 0.0.40
codegen_flags: <defaults>
</compile_context>

<pallas_src>
import functools

import jax
import jax.numpy as jnp
from jax.experimental import pallas as pl
from jax.experimental.pallas import tpu as pltpu


def _ls_ce_kernel(tgt_ref, pred_ref, loss_ref, *,
                  smoothing, ignore_index, vocab_size):
    # Logits tile (TN, V); cast to f32 inside VMEM (input may be bf16).
    x = pred_ref[...].astype(jnp.float32)

    # Numerically-stable log-sum-exp per row.  The smoothed loss only needs
    # lse, the raw row sum and the target logit, so the full log-softmax tile
    # is never materialized.
    m = jnp.max(x, axis=-1, keepdims=True)                       # (TN, 1)
    sum_exp = jnp.sum(jnp.exp(x - m), axis=-1, keepdims=True)    # (TN, 1)
    lse = m + jnp.log(sum_exp)                                   # (TN, 1)
    sum_x = jnp.sum(x, axis=-1, keepdims=True)                   # (TN, 1)

    tgt = tgt_ref[...]                                           # (TN, 1) i32
    ignore = tgt == ignore_index                                 # (TN, 1)
    tgt_c = jnp.where(ignore, 0, tgt)
    col = jax.lax.broadcasted_iota(jnp.int32, x.shape, 1)        # (TN, V)
    x_tgt = jnp.sum(jnp.where(col == tgt_c, x, 0.0),
                    axis=-1, keepdims=True)                      # (TN, 1)

    off = smoothing / (vocab_size - 1)
    logp_tgt = x_tgt - lse
    sum_logp = sum_x - float(vocab_size) * lse
    # -[(1-s)*logp_tgt + off*(sum_logp - logp_tgt)]
    loss_row = -((1.0 - smoothing - off) * logp_tgt + off * sum_logp)
    loss_ref[...] = jnp.where(ignore, 0.0, loss_row)


def _choose_tiling(n_rows, vocab, itemsize):
    """Pick a row tile from the per-generation VMEM budget."""
    try:
        vmem_cap = int(pltpu.get_tpu_info().vmem_capacity_bytes)
    except Exception:
        vmem_cap = 64 << 20   # conservative (v7x-sized) fallback
    work_budget = max(8 << 20, vmem_cap // 3)

    # sublane packing: f32 -> 8, bf16 -> 16, int8/fp8 -> 32
    pack = 8 if itemsize >= 4 else (16 if itemsize == 2 else 32)

    # 2x double-buffered input block + ~5 full-width f32 temporaries.
    bytes_per_row = vocab * (2 * itemsize + 5 * 4) + 64
    rt = int(work_budget // bytes_per_row)
    rt = min(rt, 1024)
    rt = (rt // pack) * pack
    rt = max(rt, pack)
    # Don't pad far beyond the actual row count for small problems.
    n_round = ((n_rows + pack - 1) // pack) * pack
    rt = min(rt, max(pack, n_round))

    footprint = (2 * rt * vocab * itemsize     # pred double-buffer
                 + 5 * rt * vocab * 4          # in-body f32 temporaries
                 + 4 * rt * 4                  # targets + loss rows
                 + (1 << 20))                  # slack
    vmem_limit = int(min(max(vmem_cap - (16 << 20), 16 << 20),
                         max(footprint + (4 << 20), 16 << 20)))
    return rt, vmem_limit


def label_smoothing_cross_entropy(pred, target, *, label_smoothing=0.1,
                                  ignore_index=0, row_tile=None):
    """pred: (B, S, V) float (f32 or bf16); target: (B, S) int -> scalar f32."""
    B, S, V = pred.shape
    N = B * S

    pred2 = pred.reshape(N, V)                      # keep input dtype
    tgt2 = target.reshape(N, 1).astype(jnp.int32)

    rt, vmem_limit = _choose_tiling(N, V, pred2.dtype.itemsize)
    if row_tile is not None:
        rt = int(row_tile)

    n_tiles = pl.cdiv(N, rt)
    n_pad = n_tiles * rt
    if n_pad != N:
        # Tail rows padded with ignore_index contribute zero loss / count.
        pred2 = jnp.pad(pred2, ((0, n_pad - N), (0, 0)))
        tgt2 = jnp.pad(tgt2, ((0, n_pad - N), (0, 0)),
                       constant_values=ignore_index)

    kernel = functools.partial(
        _ls_ce_kernel,
        smoothing=float(label_smoothing),
        ignore_index=int(ignore_index),
        vocab_size=int(V),
    )

    loss_rows = pl.pallas_call(
        kernel,
        out_shape=jax.ShapeDtypeStruct((n_pad, 1), jnp.float32),
        grid_spec=pltpu.PrefetchScalarGridSpec(
            num_scalar_prefetch=0,
            grid=(n_tiles,),
            in_specs=[
                pl.BlockSpec((rt, 1), lambda i: (i, 0)),   # targets
                pl.BlockSpec((rt, V), lambda i: (i, 0)),   # logits
            ],
            out_specs=pl.BlockSpec((rt, 1), lambda i: (i, 0)),
        ),
        compiler_params=pltpu.CompilerParams(
            dimension_semantics=("parallel",),
            vmem_limit_bytes=vmem_limit),
    )(tgt2, pred2)

    # Tiny final reduction in plain JAX (keeps the kernel grid parallel).
    loss_sum = jnp.sum(loss_rows)
    cnt = jnp.sum((target.reshape(-1) != ignore_index).astype(jnp.float32))
    return loss_sum / jnp.maximum(cnt, 1.0)


def _reference(pred, target, *, label_smoothing=0.1, ignore_index=0):
    """Pure-JAX reference mirroring the PyTorch module."""
    B, S, V = pred.shape
    pred = pred.reshape(-1, V).astype(jnp.float32)
    target = target.reshape(-1)
    ignore = target == ignore_index
    tgt_clamped = jnp.where(ignore, 0, target)
    true_dist = jnp.full_like(pred, label_smoothing / (V - 1))
    true_dist = true_dist.at[jnp.arange(pred.shape[0]), tgt_clamped].set(
        1.0 - label_smoothing)
    true_dist = jnp.where(ignore[:, None], 0.0, true_dist)
    logp = jax.nn.log_softmax(pred, axis=-1)
    loss = jnp.sum(-true_dist * logp, axis=-1)
    loss = jnp.where(ignore, 0.0, loss)
    denom = jnp.maximum(jnp.sum(~ignore), 1)
    return jnp.sum(loss) / denom


if __name__ == "__main__":
    # Small shapes consistent with (batch, seq, vocab) — vocab kept lane-sized.
    B, S, V = 2, 8, 128
    key = jax.random.PRNGKey(0)
    kp, kt = jax.random.split(key)
    pred = jax.random.normal(kp, (B, S, V), dtype=jnp.float32)
    # Targets in [0, V); some rows hit ignore_index=0 on purpose.
    target = jax.random.randint(kt, (B, S), 0, V, dtype=jnp.int32)
    target = target.at[0, 0].set(0).at[1, 3].set(0)

    loss = label_smoothing_cross_entropy(
        pred, target, label_smoothing=0.1, ignore_index=0)
    loss = jax.block_until_ready(loss)

    ref = _reference(pred, target, label_smoothing=0.1, ignore_index=0)
    assert jnp.allclose(loss, ref, rtol=1e-4, atol=1e-5), (loss, ref)

    # Also exercise an unaligned row count (tail padding path) and bf16 input.
    B2, S2, V2 = 3, 7, 128
    pred_b = jax.random.normal(kp, (B2, S2, V2), dtype=jnp.bfloat16)
    target_b = jax.random.randint(kt, (B2, S2), 0, V2, dtype=jnp.int32)
    loss_b = jax.block_until_ready(
        label_smoothing_cross_entropy(pred_b, target_b,
                                      label_smoothing=0.1, ignore_index=0))
    ref_b = _reference(pred_b.astype(jnp.float32), target_b,
                       label_smoothing=0.1, ignore_index=0)
    assert jnp.allclose(loss_b, ref_b, rtol=2e-2, atol=2e-2), (loss_b, ref_b)

    print("KERNEL_OK")
</pallas_src>

<mosaic_0001>
module attributes {stable_mosaic.version = 11 : i64} {
  func.func @_ls_ce_kernel(%arg0: i32, %arg1: memref<16x1xi32, #tpu.memory_space<vmem>>, %arg2: memref<16x128xf32, #tpu.memory_space<vmem>>, %arg3: memref<16x1xf32, #tpu.memory_space<vmem>>) attributes {dimension_semantics = [#tpu.dimension_semantics<parallel>], iteration_bounds = array<i64: 1>, scalar_prefetch = 0 : i64, scratch_operands = 0 : i64, tpu.core_type = #tpu.core_type<tc>, window_params = [{transform_indices = @transform_0, window_bounds = array<i64: 16, 1>}, {transform_indices = @transform_1, window_bounds = array<i64: 16, 128>}, {transform_indices = @transform_2, window_bounds = array<i64: 16, 1>}]} {
    %c0 = arith.constant 0 : index
    %c0_0 = arith.constant 0 : index
    %0 = vector.load %arg2[%c0, %c0_0] : memref<16x128xf32, #tpu.memory_space<vmem>>, vector<16x128xf32>
    %cst = arith.constant dense<0xFF800000> : vector<16xf32>
    %1 = vector.multi_reduction <maximumf>, %0, %cst [1] : vector<16x128xf32> to vector<16xf32>
    %2 = vector.shape_cast %1 : vector<16xf32> to vector<16x1xf32>
    %3 = vector.broadcast %2 : vector<16x1xf32> to vector<16x128xf32>
    %4 = arith.subf %0, %3 : vector<16x128xf32>
    %5 = math.exp %4 : vector<16x128xf32>
    %cst_1 = arith.constant dense<0.000000e+00> : vector<16xf32>
    %6 = vector.multi_reduction <add>, %5, %cst_1 [1] : vector<16x128xf32> to vector<16xf32>
    %7 = vector.shape_cast %6 : vector<16xf32> to vector<16x1xf32>
    %8 = math.log %7 : vector<16x1xf32>
    %9 = arith.addf %2, %8 : vector<16x1xf32>
    %cst_2 = arith.constant dense<0.000000e+00> : vector<16xf32>
    %10 = vector.multi_reduction <add>, %0, %cst_2 [1] : vector<16x128xf32> to vector<16xf32>
    %11 = vector.shape_cast %10 : vector<16xf32> to vector<16x1xf32>
    %c0_3 = arith.constant 0 : index
    %c0_4 = arith.constant 0 : index
    %12 = vector.load %arg1[%c0_3, %c0_4] : memref<16x1xi32, #tpu.memory_space<vmem>>, vector<16x1xi32>
    %c0_i32 = arith.constant 0 : i32
    %13 = vector.broadcast %c0_i32 : i32 to vector<16x1xi32>
    %14 = arith.cmpi eq, %12, %13 : vector<16x1xi32>
    %c0_i32_5 = arith.constant 0 : i32
    %15 = vector.broadcast %c0_i32_5 : i32 to vector<16x1xi32>
    %16 = arith.select %14, %15, %12 : vector<16x1xi1>, vector<16x1xi32>
    %17 = tpu.iota {dimensions = array<i32: 1>} : vector<16x128xi32>
    %18 = vector.broadcast %16 : vector<16x1xi32> to vector<16x128xi32>
    %19 = arith.cmpi eq, %17, %18 : vector<16x128xi32>
    %cst_6 = arith.constant 0.000000e+00 : f32
    %20 = vector.broadcast %cst_6 : f32 to vector<16x128xf32>
    %21 = arith.select %19, %0, %20 : vector<16x128xi1>, vector<16x128xf32>
    %cst_7 = arith.constant dense<0.000000e+00> : vector<16xf32>
    %22 = vector.multi_reduction <add>, %21, %cst_7 [1] : vector<16x128xf32> to vector<16xf32>
    %23 = vector.shape_cast %22 : vector<16xf32> to vector<16x1xf32>
    %24 = arith.subf %23, %9 : vector<16x1xf32>
    %cst_8 = arith.constant 1.280000e+02 : f32
    %25 = vector.broadcast %cst_8 : f32 to vector<16x1xf32>
    %26 = arith.mulf %25, %9 : vector<16x1xf32>
    %27 = arith.subf %11, %26 : vector<16x1xf32>
    %cst_9 = arith.constant 0.899212599 : f32
    %28 = vector.broadcast %cst_9 : f32 to vector<16x1xf32>
    %29 = arith.mulf %28, %24 : vector<16x1xf32>
    %cst_10 = arith.constant 7.87401571E-4 : f32
    %30 = vector.broadcast %cst_10 : f32 to vector<16x1xf32>
    %31 = arith.mulf %30, %27 : vector<16x1xf32>
    %32 = arith.addf %29, %31 : vector<16x1xf32>
    %cst_11 = arith.constant 0.000000e+00 : f32
    %33 = vector.broadcast %cst_11 : f32 to vector<16x1xf32>
    %34 = arith.subf %33, %32 : vector<16x1xf32>
    %cst_12 = arith.constant 0.000000e+00 : f32
    %35 = vector.broadcast %cst_12 : f32 to vector<16x1xf32>
    %36 = arith.select %14, %35, %34 : vector<16x1xi1>, vector<16x1xf32>
    %c0_13 = arith.constant 0 : index
    %c0_14 = arith.constant 0 : index
    %37 = vector.load %arg3[%c0_13, %c0_14] : memref<16x1xf32, #tpu.memory_space<vmem>>, vector<16x1xf32>
    tpu.vector_store %arg3[%c0_13, %c0_14], %36 {strides = array<i32>} : memref<16x1xf32, #tpu.memory_space<vmem>>, vector<16x1xf32>,
    return
  }
  func.func @transform_0(%arg0: i32) -> (i32, i32) {
    %c0_i32 = arith.constant 0 : i32
    %c0_i32_0 = arith.constant 0 : i32
    return %arg0, %c0_i32 : i32, i32
  }
  func.func @transform_1(%arg0: i32) -> (i32, i32) {
    %c0_i32 = arith.constant 0 : i32
    %c0_i32_0 = arith.constant 0 : i32
    return %arg0, %c0_i32 : i32, i32
  }
  func.func @transform_2(%arg0: i32) -> (i32, i32) {
    %c0_i32 = arith.constant 0 : i32
    %c0_i32_0 = arith.constant 0 : i32
    return %arg0, %c0_i32 : i32, i32
  }
}

</mosaic_0001>

<bundles_post_ra>
// kernel: tpu_custom_call.1
= control target key start
LH: loop header
LB: loop body
LE: loop exit
PB: predicated region body
PF: predicated region fallthrough
CT: control target
= control target key end

     0   :  { %v91_v1 = vmov 0   ;;  %v41_v7 = vlaneseq  ;;  %vm73_vm3 = vcmask 7168   ;;  %s125_s1 = inlined_call_operand.vmem [shape: f32[16,128], index: 1, kind: input, shape index: {}]   ;;  %s126_s0 = inlined_call_operand.vmem [shape: s32[16,1], index: 0, kind: input, shape index: {}]   ;;  %s127_s2 = inlined_call_operand.vmem [shape: f32[16,1], index: 2, kind: output, shape index: {}]  }
   0x1   :  { %v11_v0 = vld [vmem:[%s125_s1] sm:$0xff]  ;;  %81 = vset.pattern.permute.xlu1 %v91_v1  ;;  %82 = vset.pattern.permute.xlu0 %v91_v1  ;;  %v12_v3 = vld [vmem:[%s125_s1 + $0x8] sm:$0xff] }
   0x2   :  { %v37_v2 = vld [vmem:[%s126_s0] sm:$0xff]  ;;  %13 = vmax.xlane.f32.xlu0 %v11_v0  ;;  %v38_v4 = vld [vmem:[%s126_s0 + $0x8] sm:$0xff]  ;;  %v42_v10 = vand.u32 127, %v41_v7 }
   0x3   :  { %44 = vperm.xlu1 %81, %v37_v2   ;;  %vm39_vm2 = vcmp.eq.s32.totalorder %v37_v2, 0  ;;  %vm40_vm4 = vcmp.eq.s32.totalorder %v38_v4, 0 }
   0xa   :  { %15 = vmax.xlane.f32.xlu0 %v12_v3 }
   0xb   :  { %47 = vperm.xlu1 %81, %v38_v4  }
  0x12   :  { %33 = vadd.xlane.f32.xlu0 %v11_v0 }
  0x35   :  { %35 = vadd.xlane.f32.xlu1 %v12_v3 }
  0x75   :  { %v45_v5 = vpop.permute.xlu1 %44  ;;  %v14_v6 = vpop.xlane.xlu0 %13 }
  0x76   :  { %v17_v8 = vsub.f32 %v11_v0, %v14_v6  ;;  %vm49_vm1 = vcmp.eq.s32.totalorder %v42_v10, %v45_v5 }
  0x77   :  { %v51_v18 = vsel %vm49_vm1, %v11_v0, 0.0 }
  0x78   :  { %v19_v9 = vmul.f32 1.442695, %v17_v8 }
  0x7a   :  { %83 = vpow2.f32 %v19_v9 }
  0x7d   :  { %v48_v11 = vpop.permute.xlu1 %47  ;;  %v16_v12 = vpop.xlane.xlu0 %15 }
  0x7e   :  { %vm50_vm0 = vcmp.eq.s32.totalorder %v42_v10, %v48_v11  ;;  %v18_v13 = vsub.f32 %v12_v3, %v16_v12 }
  0x7f   :  { %v52_v14 = vsel %vm50_vm0, %v12_v3, 0.0 }
  0x80   :  { %55 = vadd.xlane.f32.xlu0 %v52_v14  ;;  %v84_v15 = vpop.eup %83  ;;  %v21_v16 = vmul.f32 1.442695, %v18_v13 }
  0x81   :  { %23 = vadd.xlane.f32.xlu2 %v84_v15 }
  0x82   :  { %85 = vpow2.f32 %v21_v16 }
  0x85   :  { %v34_v23 = vpop.xlane.xlu0 %33 }
  0x88   :  { %v86_v17 = vpop.eup %85 }
  0x89   :  { %25 = vadd.xlane.f32.xlu2 %v86_v17 }
  0x91   :  { %53 = vadd.xlane.f32.xlu2 %v51_v18 }
  0xa8   :  { %v36_v35 = vpop.xlane.xlu1 %35 }
  0xf3   :  { %v56_v33 = vpop.xlane.xlu0 %55 }
  0xf4   :  { %v24_v19 = vpop.xlane.xlu2 %23 }
  0xf5   :  { %87 = vlog2.f32 %v24_v19 }
  0xfb   :  { %v88_v20 = vpop.eup %87 }
  0xfc   :  { %v28_v21 = vmul.f32 0.6931472, %v88_v20  ;;  %v26_v22 = vpop.xlane.xlu2 %25 }
  0xfd   :  { %89 = vlog2.f32 %v26_v22 }
  0xfe   :  { %v31_v24 = vadd.f32 %v28_v21, %v14_v6 }
 0x100   :  { %v59_v25 = vmul.f32 128.0, %v31_v24 }
 0x102   :  { %v61_v27 = vsub.f32 %v34_v23, %v59_v25 }
 0x103   :  { %v90_v26 = vpop.eup %89 }
 0x104   :  { %v30_v28 = vmul.f32 0.6931472, %v90_v26  ;;  %v54_v29 = vpop.xlane.xlu2 %53  ;;  %v65_v32 = vmul.f32 0.0007874016, %v61_v27 }
 0x105   :  { %v57_v30 = vsub.f32 %v54_v29, %v31_v24 }
 0x106   :  { %v32_v31 = vadd.f32 %v30_v28, %v16_v12 }
 0x107   :  { %v63_v34 = vmul.f32 0.8992126, %v57_v30 }
 0x108   :  { %v58_v36 = vsub.f32 %v56_v33, %v32_v31  ;;  %v60_v37 = vmul.f32 128.0, %v32_v31 }
 0x109   :  { %v67_v38 = vadd.f32 %v65_v32, %v63_v34 }
 0x10a   :  { %v62_v39 = vsub.f32 %v36_v35, %v60_v37  ;;  %v64_v41 = vmul.f32 0.8992126, %v58_v36 }
 0x10b   :  { %v69_v40 = vsub.f32 0.0, %v67_v38 }
 0x10c   :  { %v66_v42 = vmul.f32 0.0007874016, %v62_v39 }
 0x10d   :  { %v71_v43 = vsel %vm39_vm2, 0.0, %v69_v40 }
 0x10e   :  { %74 = vst.msk [vmem:[%s127_s2] sm:$0xff] %vm73_vm3, %v71_v43  ;;  %v68_v44 = vadd.f32 %v66_v42, %v64_v41 }
 0x110   :  { %v70_v45 = vsub.f32 0.0, %v68_v44 }
 0x112   :  { %v72_v46 = vsel %vm40_vm4, 0.0, %v70_v45 }
 0x113   :  { %75 = vst.msk [vmem:[%s127_s2 + $0x8] sm:$0xff] %vm73_vm3, %v72_v46 }

</bundles_post_ra>
